<compile_context>
chip_gen: v5e
topology: v5e:2x2
jax: 0.10.0
libtpu: 0.0.40
codegen_flags: <defaults>
</compile_context>

<pallas_src>
import jax
import jax.numpy as jnp
from jax.experimental import pallas as pl
from jax.experimental.pallas import tpu as pltpu

# ----------------------------- problem sizes -----------------------------
B, T = 2, 8          # batch (graphs), nodes-per-graph (sequence length)
V, S = 16, 4         # token vocab size, shape-feature dim
E_TOK, E_SHP = 16, 16
E = E_TOK + E_SHP    # node-embedding dim fed to the GRU (folded away now)
H = 32               # GRU hidden size
G3 = 3 * H           # packed gate width (r|z|n) = 96  (kept <= 128 for v5e MXU)
Bp = 8               # batch padded to a full sublane tile
TB = T * Bp


# ------------------------------- the kernel ------------------------------
def rnn_shape_regressor_kernel(
    tok_ref,    # [TB, 1]  int32
    shp_ref,    # [TB, S]  f32
    wtok_ref,   # [V, 3H]  folded token-embedding -> gate weights
    wshp_ref,   # [S, 3H]  folded shape-Linear   -> gate weights
    whh_ref,    # [H, 3H]  hidden -> gate weights, lane-stacked r|z|n
    misc_ref,   # [8, 128] packed biases + regressor weight
    out_ref,    # [Bp, 128]
):
    f32 = jnp.float32

    # ---- input-side gate pre-activations, all timesteps, lane-packed [TB, 3H] ----
    tok = tok_ref[...]                                            # [TB, 1] int32
    iota_v = jax.lax.broadcasted_iota(jnp.int32, (TB, V), 1)
    onehot = (tok == iota_v).astype(f32)                          # [TB, V]

    gx_bias = misc_ref[0:1, 0:G3]                                 # [1, 3H]
    gx_all = (jnp.dot(onehot, wtok_ref[...], preferred_element_type=f32)
              + jnp.dot(shp_ref[...], wshp_ref[...], preferred_element_type=f32)
              + gx_bias)                                          # [TB, 3H]

    # ---- hoisted loop-invariants ----
    whh = whh_ref[...]                                            # [H, 3H] ~4 vregs
    b_hn = jnp.broadcast_to(misc_ref[1:2, 0:H], (Bp, H))          # b_hh_n

    h = jnp.zeros((Bp, H), f32)
    acc = jnp.zeros((Bp, H), f32)

    # ---- encoder: single-layer GRU recurrence (PyTorch gate order r, z, n) ----
    for t in range(T):                              # static trip count, unrolled
        r0 = t * Bp                                 # sublane-aligned offset
        gx = gx_all[r0:r0 + Bp, :]                  # [Bp, 3H]
        gh = jnp.dot(h, whh, preferred_element_type=f32)          # one MXU pass
        # r and z share one sigmoid push over the packed [Bp, 2H] lane band
        rz = jax.nn.sigmoid(gx[:, 0:2 * H] + gh[:, 0:2 * H])
        r = rz[:, 0:H]
        z = rz[:, H:2 * H]
        n = jnp.tanh(gx[:, 2 * H:G3] + r * (gh[:, 2 * H:G3] + b_hn))
        h = (1.0 - z) * n + z * h
        acc = acc + h                               # aggregator running sum

    # ---- aggregator (mean over nodes); dropout(p=0.0) is identity ----
    batch_emb = acc * (1.0 / T)                                   # [Bp, H]

    # ---- regressor Linear(H, 1) as VPU multiply + lane reduce; activ=None ----
    w_reg = misc_ref[2:3, 0:H]                                    # [1, H]
    b_reg = misc_ref[3:4, 0:1]                                    # [1, 1]
    pred = jnp.sum(batch_emb * w_reg, axis=-1, keepdims=True) + b_reg   # [Bp, 1]
    out_ref[...] = jnp.broadcast_to(pred, (Bp, 128))              # lane-dense store


# ------------------------------- wrapper ---------------------------------
def _pack_params(params):
    """Constant-fold embed/shape-Linear into the gate weights and pack biases."""
    w_tok_gates = params["emb"] @ params["wih_tok"]               # [V, 3H]
    w_shp_gates = params["w_shape"] @ params["wih_shp"]           # [S, 3H]
    shp_bias_g = (params["b_shape"] @ params["wih_shp"])[0]       # [3H]

    b_ih = params["b_ih"][0]
    b_hh = params["b_hh"][0]
    gx_bias = b_ih + shp_bias_g
    # b_hh for the r and z gates just adds to the pre-sigmoid argument -> fold it.
    gx_bias = gx_bias.at[0:2 * H].add(b_hh[0:2 * H])
    # b_hh_n must stay inside the r * (...) term -> kept separate.

    misc = jnp.zeros((8, 128), jnp.float32)
    misc = misc.at[0, :G3].set(gx_bias)
    misc = misc.at[1, :H].set(b_hh[2 * H:3 * H])                  # b_hh_n
    misc = misc.at[2, :H].set(params["w_reg"][:, 0])              # regressor weight
    misc = misc.at[3, 0].set(params["b_reg"][0, 0])               # regressor bias
    return w_tok_gates, w_shp_gates, params["whh"], misc


def _prep_inputs(tokens, shapes):
    """Pad batch to Bp sublanes and flatten T-major so the kernel is all-2D."""
    tok_p = jnp.zeros((Bp, T), jnp.int32).at[:B].set(tokens)
    shp_p = jnp.zeros((Bp, T, S), jnp.float32).at[:B].set(shapes)
    tok_tb = tok_p.T.reshape(TB, 1)                     # row index = t*Bp + b
    shp_tb = shp_p.transpose(1, 0, 2).reshape(TB, S)
    return tok_tb, shp_tb


def rnn_shape_regressor(tokens, shapes, params):
    w_tok, w_shp, whh, misc = _pack_params(params)
    tok_tb, shp_tb = _prep_inputs(tokens, shapes)

    ins = (tok_tb, shp_tb, w_tok, w_shp, whh, misc)
    vmem = pl.BlockSpec(memory_space=pltpu.MemorySpace.VMEM)
    out = pl.pallas_call(
        rnn_shape_regressor_kernel,
        out_shape=jax.ShapeDtypeStruct((Bp, 128), jnp.float32),
        in_specs=[vmem] * len(ins),
        out_specs=vmem,
    )(*ins)
    # TODO(synk): for large fleets of graphs, grid over the (padded) batch axis
    # with dimension_semantics=("parallel",) so v7x's two TensorCores are both
    # used, and re-derive batch-tile sizes against v7x's 64 MiB VMEM.
    return out[:B, 0:1]


# --------------------------- pure-JAX reference ---------------------------
def reference(tokens, shapes, params):
    tok_emb = jnp.take(params["emb"], tokens, axis=0)               # [B, T, E_TOK]
    shp_emb = shapes @ params["w_shape"] + params["b_shape"]        # [B, T, E_SHP]
    x = jnp.concatenate([tok_emb, shp_emb], axis=-1)                # [B, T, E]
    w_ih = jnp.concatenate([params["wih_tok"], params["wih_shp"]], axis=0)  # [E, 3H]
    h = jnp.zeros((B, H), jnp.float32)
    outs = []
    for t in range(T):
        gx = x[:, t, :] @ w_ih + params["b_ih"]
        gh = h @ params["whh"] + params["b_hh"]
        r = jax.nn.sigmoid(gx[:, :H] + gh[:, :H])
        z = jax.nn.sigmoid(gx[:, H:2 * H] + gh[:, H:2 * H])
        n = jnp.tanh(gx[:, 2 * H:] + r * gh[:, 2 * H:])
        h = (1.0 - z) * n + z * h
        outs.append(h)
    batch_emb = jnp.mean(jnp.stack(outs, axis=1), axis=1)           # [B, H]
    return batch_emb @ params["w_reg"] + params["b_reg"]            # [B, 1]


# --------------------------------- main -----------------------------------
if __name__ == "__main__":
    key = jax.random.PRNGKey(0)
    keys = jax.random.split(key, 12)

    tokens = jax.random.randint(keys[0], (B, T), 0, V, dtype=jnp.int32)
    shapes = jax.random.normal(keys[1], (B, T, S), dtype=jnp.float32)

    def w(k, shape, scale=0.1):
        return scale * jax.random.normal(k, shape, dtype=jnp.float32)

    params = {
        "emb":     w(keys[2], (V, E_TOK)),
        "w_shape": w(keys[3], (S, E_SHP)),
        "b_shape": w(keys[4], (1, E_SHP)),
        "wih_tok": w(keys[5], (E_TOK, 3 * H)),   # rows 0:E_TOK of W_ih^T
        "wih_shp": w(keys[6], (E_SHP, 3 * H)),   # rows E_TOK:E of W_ih^T
        "b_ih":    w(keys[7], (1, 3 * H)),
        "whh":     w(keys[8], (H, 3 * H)),
        "b_hh":    w(keys[9], (1, 3 * H)),
        "w_reg":   w(keys[10], (H, 1)),
        "b_reg":   w(keys[11], (1, 1)),
    }

    out = jax.block_until_ready(rnn_shape_regressor(tokens, shapes, params))
    ref = reference(tokens, shapes, params)

    assert out.shape == (B, 1)
    assert jnp.allclose(out, ref, atol=1e-4, rtol=1e-4), (out, ref)
    print("KERNEL_OK")
</pallas_src>

<mosaic_0001>
module attributes {stable_mosaic.version = 11 : i64} {
  func.func @rnn_shape_regressor_kernel(%arg0: memref<64x1xi32, #tpu.memory_space<vmem>>, %arg1: memref<64x4xf32, #tpu.memory_space<vmem>>, %arg2: memref<16x96xf32, #tpu.memory_space<vmem>>, %arg3: memref<4x96xf32, #tpu.memory_space<vmem>>, %arg4: memref<32x96xf32, #tpu.memory_space<vmem>>, %arg5: memref<8x128xf32, #tpu.memory_space<vmem>>, %arg6: memref<8x128xf32, #tpu.memory_space<vmem>>) attributes {dimension_semantics = [], scalar_prefetch = 0 : i64, scratch_operands = 0 : i64, tpu.core_type = #tpu.core_type<tc>} {
    %c0 = arith.constant 0 : index
    %c0_0 = arith.constant 0 : index
    %0 = vector.load %arg0[%c0, %c0_0] : memref<64x1xi32, #tpu.memory_space<vmem>>, vector<64x1xi32>
    %1 = tpu.iota {dimensions = array<i32: 1>} : vector<64x16xi32>
    %2 = vector.broadcast %0 : vector<64x1xi32> to vector<64x16xi32>
    %3 = arith.cmpi eq, %2, %1 : vector<64x16xi32>
    %4 = arith.extui %3 : vector<64x16xi1> to vector<64x16xi32>
    %5 = arith.sitofp %4 : vector<64x16xi32> to vector<64x16xf32>
    %c0_1 = arith.constant 0 : index
    %c0_2 = arith.constant 0 : index
    %6 = vector.load %arg5[%c0_1, %c0_2] : memref<8x128xf32, #tpu.memory_space<vmem>>, vector<1x96xf32>
    %c0_3 = arith.constant 0 : index
    %c0_4 = arith.constant 0 : index
    %7 = vector.load %arg2[%c0_3, %c0_4] : memref<16x96xf32, #tpu.memory_space<vmem>>, vector<16x96xf32>
    %cst = arith.constant dense<0.000000e+00> : vector<64x96xf32>
    %8 = tpu.matmul %5, %7, %cst {dimension_numbers = #tpu.dot_dimension_numbers<[1], [0], [0], [1], [0, 0, 1, 1], [], []>} : vector<64x16xf32>, vector<16x96xf32>, vector<64x96xf32> -> vector<64x96xf32>
    %c0_5 = arith.constant 0 : index
    %c0_6 = arith.constant 0 : index
    %9 = vector.load %arg1[%c0_5, %c0_6] : memref<64x4xf32, #tpu.memory_space<vmem>>, vector<64x4xf32>
    %c0_7 = arith.constant 0 : index
    %c0_8 = arith.constant 0 : index
    %10 = vector.load %arg3[%c0_7, %c0_8] : memref<4x96xf32, #tpu.memory_space<vmem>>, vector<4x96xf32>
    %cst_9 = arith.constant dense<0.000000e+00> : vector<64x96xf32>
    %11 = tpu.matmul %9, %10, %cst_9 {dimension_numbers = #tpu.dot_dimension_numbers<[1], [0], [0], [1], [0, 0, 1, 1], [], []>} : vector<64x4xf32>, vector<4x96xf32>, vector<64x96xf32> -> vector<64x96xf32>
    %12 = arith.addf %8, %11 : vector<64x96xf32>
    %13 = vector.broadcast %6 : vector<1x96xf32> to vector<64x96xf32>
    %14 = arith.addf %12, %13 : vector<64x96xf32>
    %c0_10 = arith.constant 0 : index
    %c0_11 = arith.constant 0 : index
    %15 = vector.load %arg4[%c0_10, %c0_11] : memref<32x96xf32, #tpu.memory_space<vmem>>, vector<32x96xf32>
    %c1 = arith.constant 1 : index
    %c0_12 = arith.constant 0 : index
    %16 = vector.load %arg5[%c1, %c0_12] : memref<8x128xf32, #tpu.memory_space<vmem>>, vector<1x32xf32>
    %17 = vector.shape_cast %16 : vector<1x32xf32> to vector<1x32xf32>
    %18 = vector.broadcast %17 : vector<1x32xf32> to vector<8x32xf32>
    %cst_13 = arith.constant 0.000000e+00 : f32
    %19 = vector.broadcast %cst_13 : f32 to vector<8x32xf32>
    %cst_14 = arith.constant 0.000000e+00 : f32
    %20 = vector.broadcast %cst_14 : f32 to vector<8x32xf32>
    %21 = vector.extract_strided_slice %14 {offsets = [0, 0], sizes = [8, 96], strides = [1, 1]} : vector<64x96xf32> to vector<8x96xf32>
    %cst_15 = arith.constant dense<0.000000e+00> : vector<8x96xf32>
    %22 = tpu.matmul %19, %15, %cst_15 {dimension_numbers = #tpu.dot_dimension_numbers<[1], [0], [0], [1], [0, 0, 1, 1], [], []>} : vector<8x32xf32>, vector<32x96xf32>, vector<8x96xf32> -> vector<8x96xf32>
    %23 = vector.extract_strided_slice %21 {offsets = [0, 0], sizes = [8, 64], strides = [1, 1]} : vector<8x96xf32> to vector<8x64xf32>
    %24 = vector.extract_strided_slice %22 {offsets = [0, 0], sizes = [8, 64], strides = [1, 1]} : vector<8x96xf32> to vector<8x64xf32>
    %25 = arith.addf %23, %24 : vector<8x64xf32>
    %26 = arith.negf %25 : vector<8x64xf32>
    %27 = math.exp %26 : vector<8x64xf32>
    %cst_16 = arith.constant 1.000000e+00 : f32
    %28 = vector.broadcast %cst_16 : f32 to vector<8x64xf32>
    %29 = arith.addf %28, %27 : vector<8x64xf32>
    %30 = arith.divf %28, %29 : vector<8x64xf32>
    %31 = vector.extract_strided_slice %30 {offsets = [0, 0], sizes = [8, 32], strides = [1, 1]} : vector<8x64xf32> to vector<8x32xf32>
    %32 = vector.extract_strided_slice %30 {offsets = [0, 32], sizes = [8, 32], strides = [1, 1]} : vector<8x64xf32> to vector<8x32xf32>
    %33 = vector.extract_strided_slice %21 {offsets = [0, 64], sizes = [8, 32], strides = [1, 1]} : vector<8x96xf32> to vector<8x32xf32>
    %34 = vector.extract_strided_slice %22 {offsets = [0, 64], sizes = [8, 32], strides = [1, 1]} : vector<8x96xf32> to vector<8x32xf32>
    %35 = arith.addf %34, %18 : vector<8x32xf32>
    %36 = arith.mulf %31, %35 : vector<8x32xf32>
    %37 = arith.addf %33, %36 : vector<8x32xf32>
    %38 = math.tanh %37 : vector<8x32xf32>
    %cst_17 = arith.constant 1.000000e+00 : f32
    %39 = vector.broadcast %cst_17 : f32 to vector<8x32xf32>
    %40 = arith.subf %39, %32 : vector<8x32xf32>
    %41 = arith.mulf %40, %38 : vector<8x32xf32>
    %42 = arith.mulf %32, %19 : vector<8x32xf32>
    %43 = arith.addf %41, %42 : vector<8x32xf32>
    %44 = arith.addf %20, %43 : vector<8x32xf32>
    %45 = vector.extract_strided_slice %14 {offsets = [8, 0], sizes = [8, 96], strides = [1, 1]} : vector<64x96xf32> to vector<8x96xf32>
    %cst_18 = arith.constant dense<0.000000e+00> : vector<8x96xf32>
    %46 = tpu.matmul %43, %15, %cst_18 {dimension_numbers = #tpu.dot_dimension_numbers<[1], [0], [0], [1], [0, 0, 1, 1], [], []>} : vector<8x32xf32>, vector<32x96xf32>, vector<8x96xf32> -> vector<8x96xf32>
    %47 = vector.extract_strided_slice %45 {offsets = [0, 0], sizes = [8, 64], strides = [1, 1]} : vector<8x96xf32> to vector<8x64xf32>
    %48 = vector.extract_strided_slice %46 {offsets = [0, 0], sizes = [8, 64], strides = [1, 1]} : vector<8x96xf32> to vector<8x64xf32>
    %49 = arith.addf %47, %48 : vector<8x64xf32>
    %50 = arith.negf %49 : vector<8x64xf32>
    %51 = math.exp %50 : vector<8x64xf32>
    %cst_19 = arith.constant 1.000000e+00 : f32
    %52 = vector.broadcast %cst_19 : f32 to vector<8x64xf32>
    %53 = arith.addf %52, %51 : vector<8x64xf32>
    %54 = arith.divf %52, %53 : vector<8x64xf32>
    %55 = vector.extract_strided_slice %54 {offsets = [0, 0], sizes = [8, 32], strides = [1, 1]} : vector<8x64xf32> to vector<8x32xf32>
    %56 = vector.extract_strided_slice %54 {offsets = [0, 32], sizes = [8, 32], strides = [1, 1]} : vector<8x64xf32> to vector<8x32xf32>
    %57 = vector.extract_strided_slice %45 {offsets = [0, 64], sizes = [8, 32], strides = [1, 1]} : vector<8x96xf32> to vector<8x32xf32>
    %58 = vector.extract_strided_slice %46 {offsets = [0, 64], sizes = [8, 32], strides = [1, 1]} : vector<8x96xf32> to vector<8x32xf32>
    %59 = arith.addf %58, %18 : vector<8x32xf32>
    %60 = arith.mulf %55, %59 : vector<8x32xf32>
    %61 = arith.addf %57, %60 : vector<8x32xf32>
    %62 = math.tanh %61 : vector<8x32xf32>
    %cst_20 = arith.constant 1.000000e+00 : f32
    %63 = vector.broadcast %cst_20 : f32 to vector<8x32xf32>
    %64 = arith.subf %63, %56 : vector<8x32xf32>
    %65 = arith.mulf %64, %62 : vector<8x32xf32>
    %66 = arith.mulf %56, %43 : vector<8x32xf32>
    %67 = arith.addf %65, %66 : vector<8x32xf32>
    %68 = arith.addf %44, %67 : vector<8x32xf32>
    %69 = vector.extract_strided_slice %14 {offsets = [16, 0], sizes = [8, 96], strides = [1, 1]} : vector<64x96xf32> to vector<8x96xf32>
    %cst_21 = arith.constant dense<0.000000e+00> : vector<8x96xf32>
    %70 = tpu.matmul %67, %15, %cst_21 {dimension_numbers = #tpu.dot_dimension_numbers<[1], [0], [0], [1], [0, 0, 1, 1], [], []>} : vector<8x32xf32>, vector<32x96xf32>, vector<8x96xf32> -> vector<8x96xf32>
    %71 = vector.extract_strided_slice %69 {offsets = [0, 0], sizes = [8, 64], strides = [1, 1]} : vector<8x96xf32> to vector<8x64xf32>
    %72 = vector.extract_strided_slice %70 {offsets = [0, 0], sizes = [8, 64], strides = [1, 1]} : vector<8x96xf32> to vector<8x64xf32>
    %73 = arith.addf %71, %72 : vector<8x64xf32>
    %74 = arith.negf %73 : vector<8x64xf32>
    %75 = math.exp %74 : vector<8x64xf32>
    %cst_22 = arith.constant 1.000000e+00 : f32
    %76 = vector.broadcast %cst_22 : f32 to vector<8x64xf32>
    %77 = arith.addf %76, %75 : vector<8x64xf32>
    %78 = arith.divf %76, %77 : vector<8x64xf32>
    %79 = vector.extract_strided_slice %78 {offsets = [0, 0], sizes = [8, 32], strides = [1, 1]} : vector<8x64xf32> to vector<8x32xf32>
    %80 = vector.extract_strided_slice %78 {offsets = [0, 32], sizes = [8, 32], strides = [1, 1]} : vector<8x64xf32> to vector<8x32xf32>
    %81 = vector.extract_strided_slice %69 {offsets = [0, 64], sizes = [8, 32], strides = [1, 1]} : vector<8x96xf32> to vector<8x32xf32>
    %82 = vector.extract_strided_slice %70 {offsets = [0, 64], sizes = [8, 32], strides = [1, 1]} : vector<8x96xf32> to vector<8x32xf32>
    %83 = arith.addf %82, %18 : vector<8x32xf32>
    %84 = arith.mulf %79, %83 : vector<8x32xf32>
    %85 = arith.addf %81, %84 : vector<8x32xf32>
    %86 = math.tanh %85 : vector<8x32xf32>
    %cst_23 = arith.constant 1.000000e+00 : f32
    %87 = vector.broadcast %cst_23 : f32 to vector<8x32xf32>
    %88 = arith.subf %87, %80 : vector<8x32xf32>
    %89 = arith.mulf %88, %86 : vector<8x32xf32>
    %90 = arith.mulf %80, %67 : vector<8x32xf32>
    %91 = arith.addf %89, %90 : vector<8x32xf32>
    %92 = arith.addf %68, %91 : vector<8x32xf32>
    %93 = vector.extract_strided_slice %14 {offsets = [24, 0], sizes = [8, 96], strides = [1, 1]} : vector<64x96xf32> to vector<8x96xf32>
    %cst_24 = arith.constant dense<0.000000e+00> : vector<8x96xf32>
    %94 = tpu.matmul %91, %15, %cst_24 {dimension_numbers = #tpu.dot_dimension_numbers<[1], [0], [0], [1], [0, 0, 1, 1], [], []>} : vector<8x32xf32>, vector<32x96xf32>, vector<8x96xf32> -> vector<8x96xf32>
    %95 = vector.extract_strided_slice %93 {offsets = [0, 0], sizes = [8, 64], strides = [1, 1]} : vector<8x96xf32> to vector<8x64xf32>
    %96 = vector.extract_strided_slice %94 {offsets = [0, 0], sizes = [8, 64], strides = [1, 1]} : vector<8x96xf32> to vector<8x64xf32>
    %97 = arith.addf %95, %96 : vector<8x64xf32>
    %98 = arith.negf %97 : vector<8x64xf32>
    %99 = math.exp %98 : vector<8x64xf32>
    %cst_25 = arith.constant 1.000000e+00 : f32
    %100 = vector.broadcast %cst_25 : f32 to vector<8x64xf32>
    %101 = arith.addf %100, %99 : vector<8x64xf32>
    %102 = arith.divf %100, %101 : vector<8x64xf32>
    %103 = vector.extract_strided_slice %102 {offsets = [0, 0], sizes = [8, 32], strides = [1, 1]} : vector<8x64xf32> to vector<8x32xf32>
    %104 = vector.extract_strided_slice %102 {offsets = [0, 32], sizes = [8, 32], strides = [1, 1]} : vector<8x64xf32> to vector<8x32xf32>
    %105 = vector.extract_strided_slice %93 {offsets = [0, 64], sizes = [8, 32], strides = [1, 1]} : vector<8x96xf32> to vector<8x32xf32>
    %106 = vector.extract_strided_slice %94 {offsets = [0, 64], sizes = [8, 32], strides = [1, 1]} : vector<8x96xf32> to vector<8x32xf32>
    %107 = arith.addf %106, %18 : vector<8x32xf32>
    %108 = arith.mulf %103, %107 : vector<8x32xf32>
    %109 = arith.addf %105, %108 : vector<8x32xf32>
    %110 = math.tanh %109 : vector<8x32xf32>
    %cst_26 = arith.constant 1.000000e+00 : f32
    %111 = vector.broadcast %cst_26 : f32 to vector<8x32xf32>
    %112 = arith.subf %111, %104 : vector<8x32xf32>
    %113 = arith.mulf %112, %110 : vector<8x32xf32>
    %114 = arith.mulf %104, %91 : vector<8x32xf32>
    %115 = arith.addf %113, %114 : vector<8x32xf32>
    %116 = arith.addf %92, %115 : vector<8x32xf32>
    %117 = vector.extract_strided_slice %14 {offsets = [32, 0], sizes = [8, 96], strides = [1, 1]} : vector<64x96xf32> to vector<8x96xf32>
    %cst_27 = arith.constant dense<0.000000e+00> : vector<8x96xf32>
    %118 = tpu.matmul %115, %15, %cst_27 {dimension_numbers = #tpu.dot_dimension_numbers<[1], [0], [0], [1], [0, 0, 1, 1], [], []>} : vector<8x32xf32>, vector<32x96xf32>, vector<8x96xf32> -> vector<8x96xf32>
    %119 = vector.extract_strided_slice %117 {offsets = [0, 0], sizes = [8, 64], strides = [1, 1]} : vector<8x96xf32> to vector<8x64xf32>
    %120 = vector.extract_strided_slice %118 {offsets = [0, 0], sizes = [8, 64], strides = [1, 1]} : vector<8x96xf32> to vector<8x64xf32>
    %121 = arith.addf %119, %120 : vector<8x64xf32>
    %122 = arith.negf %121 : vector<8x64xf32>
    %123 = math.exp %122 : vector<8x64xf32>
    %cst_28 = arith.constant 1.000000e+00 : f32
    %124 = vector.broadcast %cst_28 : f32 to vector<8x64xf32>
    %125 = arith.addf %124, %123 : vector<8x64xf32>
    %126 = arith.divf %124, %125 : vector<8x64xf32>
    %127 = vector.extract_strided_slice %126 {offsets = [0, 0], sizes = [8, 32], strides = [1, 1]} : vector<8x64xf32> to vector<8x32xf32>
    %128 = vector.extract_strided_slice %126 {offsets = [0, 32], sizes = [8, 32], strides = [1, 1]} : vector<8x64xf32> to vector<8x32xf32>
    %129 = vector.extract_strided_slice %117 {offsets = [0, 64], sizes = [8, 32], strides = [1, 1]} : vector<8x96xf32> to vector<8x32xf32>
    %130 = vector.extract_strided_slice %118 {offsets = [0, 64], sizes = [8, 32], strides = [1, 1]} : vector<8x96xf32> to vector<8x32xf32>
    %131 = arith.addf %130, %18 : vector<8x32xf32>
    %132 = arith.mulf %127, %131 : vector<8x32xf32>
    %133 = arith.addf %129, %132 : vector<8x32xf32>
    %134 = math.tanh %133 : vector<8x32xf32>
    %cst_29 = arith.constant 1.000000e+00 : f32
    %135 = vector.broadcast %cst_29 : f32 to vector<8x32xf32>
    %136 = arith.subf %135, %128 : vector<8x32xf32>
    %137 = arith.mulf %136, %134 : vector<8x32xf32>
    %138 = arith.mulf %128, %115 : vector<8x32xf32>
    %139 = arith.addf %137, %138 : vector<8x32xf32>
    %140 = arith.addf %116, %139 : vector<8x32xf32>
    %141 = vector.extract_strided_slice %14 {offsets = [40, 0], sizes = [8, 96], strides = [1, 1]} : vector<64x96xf32> to vector<8x96xf32>
    %cst_30 = arith.constant dense<0.000000e+00> : vector<8x96xf32>
    %142 = tpu.matmul %139, %15, %cst_30 {dimension_numbers = #tpu.dot_dimension_numbers<[1], [0], [0], [1], [0, 0, 1, 1], [], []>} : vector<8x32xf32>, vector<32x96xf32>, vector<8x96xf32> -> vector<8x96xf32>
    %143 = vector.extract_strided_slice %141 {offsets = [0, 0], sizes = [8, 64], strides = [1, 1]} : vector<8x96xf32> to vector<8x64xf32>
    %144 = vector.extract_strided_slice %142 {offsets = [0, 0], sizes = [8, 64], strides = [1, 1]} : vector<8x96xf32> to vector<8x64xf32>
    %145 = arith.addf %143, %144 : vector<8x64xf32>
    %146 = arith.negf %145 : vector<8x64xf32>
    %147 = math.exp %146 : vector<8x64xf32>
    %cst_31 = arith.constant 1.000000e+00 : f32
    %148 = vector.broadcast %cst_31 : f32 to vector<8x64xf32>
    %149 = arith.addf %148, %147 : vector<8x64xf32>
    %150 = arith.divf %148, %149 : vector<8x64xf32>
    %151 = vector.extract_strided_slice %150 {offsets = [0, 0], sizes = [8, 32], strides = [1, 1]} : vector<8x64xf32> to vector<8x32xf32>
    %152 = vector.extract_strided_slice %150 {offsets = [0, 32], sizes = [8, 32], strides = [1, 1]} : vector<8x64xf32> to vector<8x32xf32>
    %153 = vector.extract_strided_slice %141 {offsets = [0, 64], sizes = [8, 32], strides = [1, 1]} : vector<8x96xf32> to vector<8x32xf32>
    %154 = vector.extract_strided_slice %142 {offsets = [0, 64], sizes = [8, 32], strides = [1, 1]} : vector<8x96xf32> to vector<8x32xf32>
    %155 = arith.addf %154, %18 : vector<8x32xf32>
    %156 = arith.mulf %151, %155 : vector<8x32xf32>
    %157 = arith.addf %153, %156 : vector<8x32xf32>
    %158 = math.tanh %157 : vector<8x32xf32>
    %cst_32 = arith.constant 1.000000e+00 : f32
    %159 = vector.broadcast %cst_32 : f32 to vector<8x32xf32>
    %160 = arith.subf %159, %152 : vector<8x32xf32>
    %161 = arith.mulf %160, %158 : vector<8x32xf32>
    %162 = arith.mulf %152, %139 : vector<8x32xf32>
    %163 = arith.addf %161, %162 : vector<8x32xf32>
    %164 = arith.addf %140, %163 : vector<8x32xf32>
    %165 = vector.extract_strided_slice %14 {offsets = [48, 0], sizes = [8, 96], strides = [1, 1]} : vector<64x96xf32> to vector<8x96xf32>
    %cst_33 = arith.constant dense<0.000000e+00> : vector<8x96xf32>
    %166 = tpu.matmul %163, %15, %cst_33 {dimension_numbers = #tpu.dot_dimension_numbers<[1], [0], [0], [1], [0, 0, 1, 1], [], []>} : vector<8x32xf32>, vector<32x96xf32>, vector<8x96xf32> -> vector<8x96xf32>
    %167 = vector.extract_strided_slice %165 {offsets = [0, 0], sizes = [8, 64], strides = [1, 1]} : vector<8x96xf32> to vector<8x64xf32>
    %168 = vector.extract_strided_slice %166 {offsets = [0, 0], sizes = [8, 64], strides = [1, 1]} : vector<8x96xf32> to vector<8x64xf32>
    %169 = arith.addf %167, %168 : vector<8x64xf32>
    %170 = arith.negf %169 : vector<8x64xf32>
    %171 = math.exp %170 : vector<8x64xf32>
    %cst_34 = arith.constant 1.000000e+00 : f32
    %172 = vector.broadcast %cst_34 : f32 to vector<8x64xf32>
    %173 = arith.addf %172, %171 : vector<8x64xf32>
    %174 = arith.divf %172, %173 : vector<8x64xf32>
    %175 = vector.extract_strided_slice %174 {offsets = [0, 0], sizes = [8, 32], strides = [1, 1]} : vector<8x64xf32> to vector<8x32xf32>
    %176 = vector.extract_strided_slice %174 {offsets = [0, 32], sizes = [8, 32], strides = [1, 1]} : vector<8x64xf32> to vector<8x32xf32>
    %177 = vector.extract_strided_slice %165 {offsets = [0, 64], sizes = [8, 32], strides = [1, 1]} : vector<8x96xf32> to vector<8x32xf32>
    %178 = vector.extract_strided_slice %166 {offsets = [0, 64], sizes = [8, 32], strides = [1, 1]} : vector<8x96xf32> to vector<8x32xf32>
    %179 = arith.addf %178, %18 : vector<8x32xf32>
    %180 = arith.mulf %175, %179 : vector<8x32xf32>
    %181 = arith.addf %177, %180 : vector<8x32xf32>
    %182 = math.tanh %181 : vector<8x32xf32>
    %cst_35 = arith.constant 1.000000e+00 : f32
    %183 = vector.broadcast %cst_35 : f32 to vector<8x32xf32>
    %184 = arith.subf %183, %176 : vector<8x32xf32>
    %185 = arith.mulf %184, %182 : vector<8x32xf32>
    %186 = arith.mulf %176, %163 : vector<8x32xf32>
    %187 = arith.addf %185, %186 : vector<8x32xf32>
    %188 = arith.addf %164, %187 : vector<8x32xf32>
    %189 = vector.extract_strided_slice %14 {offsets = [56, 0], sizes = [8, 96], strides = [1, 1]} : vector<64x96xf32> to vector<8x96xf32>
    %cst_36 = arith.constant dense<0.000000e+00> : vector<8x96xf32>
    %190 = tpu.matmul %187, %15, %cst_36 {dimension_numbers = #tpu.dot_dimension_numbers<[1], [0], [0], [1], [0, 0, 1, 1], [], []>} : vector<8x32xf32>, vector<32x96xf32>, vector<8x96xf32> -> vector<8x96xf32>
    %191 = vector.extract_strided_slice %189 {offsets = [0, 0], sizes = [8, 64], strides = [1, 1]} : vector<8x96xf32> to vector<8x64xf32>
    %192 = vector.extract_strided_slice %190 {offsets = [0, 0], sizes = [8, 64], strides = [1, 1]} : vector<8x96xf32> to vector<8x64xf32>
    %193 = arith.addf %191, %192 : vector<8x64xf32>
    %194 = arith.negf %193 : vector<8x64xf32>
    %195 = math.exp %194 : vector<8x64xf32>
    %cst_37 = arith.constant 1.000000e+00 : f32
    %196 = vector.broadcast %cst_37 : f32 to vector<8x64xf32>
    %197 = arith.addf %196, %195 : vector<8x64xf32>
    %198 = arith.divf %196, %197 : vector<8x64xf32>
    %199 = vector.extract_strided_slice %198 {offsets = [0, 0], sizes = [8, 32], strides = [1, 1]} : vector<8x64xf32> to vector<8x32xf32>
    %200 = vector.extract_strided_slice %198 {offsets = [0, 32], sizes = [8, 32], strides = [1, 1]} : vector<8x64xf32> to vector<8x32xf32>
    %201 = vector.extract_strided_slice %189 {offsets = [0, 64], sizes = [8, 32], strides = [1, 1]} : vector<8x96xf32> to vector<8x32xf32>
    %202 = vector.extract_strided_slice %190 {offsets = [0, 64], sizes = [8, 32], strides = [1, 1]} : vector<8x96xf32> to vector<8x32xf32>
    %203 = arith.addf %202, %18 : vector<8x32xf32>
    %204 = arith.mulf %199, %203 : vector<8x32xf32>
    %205 = arith.addf %201, %204 : vector<8x32xf32>
    %206 = math.tanh %205 : vector<8x32xf32>
    %cst_38 = arith.constant 1.000000e+00 : f32
    %207 = vector.broadcast %cst_38 : f32 to vector<8x32xf32>
    %208 = arith.subf %207, %200 : vector<8x32xf32>
    %209 = arith.mulf %208, %206 : vector<8x32xf32>
    %210 = arith.mulf %200, %187 : vector<8x32xf32>
    %211 = arith.addf %209, %210 : vector<8x32xf32>
    %212 = arith.addf %188, %211 : vector<8x32xf32>
    %cst_39 = arith.constant 1.250000e-01 : f32
    %213 = vector.broadcast %cst_39 : f32 to vector<8x32xf32>
    %214 = arith.mulf %212, %213 : vector<8x32xf32>
    %c2 = arith.constant 2 : index
    %c0_40 = arith.constant 0 : index
    %215 = vector.load %arg5[%c2, %c0_40] : memref<8x128xf32, #tpu.memory_space<vmem>>, vector<1x32xf32>
    %c3 = arith.constant 3 : index
    %c0_41 = arith.constant 0 : index
    %216 = vector.load %arg5[%c3, %c0_41] : memref<8x128xf32, #tpu.memory_space<vmem>>, vector<1x1xf32>
    %217 = vector.broadcast %215 : vector<1x32xf32> to vector<8x32xf32>
    %218 = arith.mulf %214, %217 : vector<8x32xf32>
    %cst_42 = arith.constant dense<0.000000e+00> : vector<8xf32>
    %219 = vector.multi_reduction <add>, %218, %cst_42 [1] : vector<8x32xf32> to vector<8xf32>
    %220 = vector.shape_cast %219 : vector<8xf32> to vector<8x1xf32>
    %221 = vector.broadcast %216 : vector<1x1xf32> to vector<8x1xf32>
    %222 = arith.addf %220, %221 : vector<8x1xf32>
    %223 = vector.shape_cast %222 : vector<8x1xf32> to vector<8x1xf32>
    %224 = vector.broadcast %223 : vector<8x1xf32> to vector<8x128xf32>
    %c0_43 = arith.constant 0 : index
    %c0_44 = arith.constant 0 : index
    %225 = vector.load %arg6[%c0_43, %c0_44] : memref<8x128xf32, #tpu.memory_space<vmem>>, vector<8x128xf32>
    tpu.vector_store %arg6[%c0_43, %c0_44], %224 {strides = array<i32>} : memref<8x128xf32, #tpu.memory_space<vmem>>, vector<8x128xf32>,
    return
  }
}

</mosaic_0001>

<bundles_post_ra>
// kernel: tpu_custom_call.1
= control target key start
LH: loop header
LB: loop body
LE: loop exit
PB: predicated region body
PF: predicated region fallthrough
CT: control target
= control target key end

     0   :  { %vm119_vm0 = vcmask 1043456   ;;  %v946_v2 = vmov 0   ;;  %vm94_vm1 = vcmask 31744   ;;  %s1246_s0 = inlined_call_operand.vmem [shape: s32[64,1], index: 0, kind: input, shape index: {}]   ;;  %s1247_s1 = inlined_call_operand.vmem [shape: f32[64,4], index: 1, kind: input, shape index: {}]   ;;  %s1248_s2 = inlined_call_operand.vmem [shape: f32[16,96], index: 2, kind: input, shape index: {}]   ;;  %s1249_s3 = inlined_call_operand.vmem [shape: f32[4,96], index: 3, kind: input, shape index: {}]   ;;  %s1250_s4 = inlined_call_operand.vmem [shape: f32[32,96], index: 4, kind: input, shape index: {}]   ;;  %s1251_s5 = inlined_call_operand.vmem [shape: f32[8,128], index: 5, kind: input, shape index: {}]   ;;  %s1252_s6 = inlined_call_operand.hbm [shape: f32[8,128], index: 6, kind: output, shape index: {}]  }
   0x1   :  { %v30_v0 = vld [vmem:[%s1246_s0 + $0x30] sm:$0xff]  ;;  %v24_v1 = vld [vmem:[%s1246_s0] sm:$0xff]  ;;  %865 = vset.pattern.permute.xlu0 %v946_v2  ;;  %866 = vset.pattern.permute.xlu1 %v946_v2  ;;  %v84_v5 = vld [vmem:[%s1248_s2 + $0x8] sm:$0xff] }
   0x2   :  { %v93_v3 = vld [vmem:[%s1249_s3] sm:$0xf]  ;;  %53 = vperm.xlu0 %865, %v30_v0   ;;  %35 = vperm.xlu1 %866, %v24_v1  }
   0x3   :  { %v85_v4 = vld [vmem:[%s1247_s1] sm:$0xff]  ;;  %824 = vmatpush.msk.msra.mxu0 %vm119_vm0, %v93_v3  ;;  %856 = vmatpush.msk.msra.mxu3 %vm119_vm0, %v93_v3 }
   0x4   :  { %825 = vmatmul.msk.f32.vlgmr.msra.gmra.mxu0 %vm94_vm1, %v85_v4  ;;  %867 = vset.pattern.permute.xlu2 %v946_v2 }
   0x5   :  { %11 = vsyncpa [#allocation3], 0  ;;  %857 = vmatpush.msra.mxu2 %v84_v5  ;;  %203 = vmatpush.msra.mxu1 %v84_v5  ;;  %v31_v6 = vld [vmem:[%s1246_s0 + $0x38] sm:$0xff]  ;;  %v86_v7 = vld [vmem:[%s1247_s1 + $0x8] sm:$0xff]  ;;  %v32_v20 = vlaneseq  ;;  %vm164_vm2 = vcmask 130048   ;;  %v948_v24 = vmov 0.0  }
   0x6   :  { %v87_v8 = vld [vmem:[%s1247_s1 + $0x10] sm:$0xff]  ;;  %v88_v9 = vld [vmem:[%s1247_s1 + $0x18] sm:$0xff]  ;;  %v89_v10 = vld [vmem:[%s1247_s1 + $0x20] sm:$0xff]  ;;  %s949_s9 = smov 96   ;;  %vm245_vm11 = vcmask 261120   ;;  %s950_s21 = smov 32  }
   0x7   :  { %v90_v11 = vld [vmem:[%s1247_s1 + $0x28] sm:$0xff]  ;;  %v83_v12 = vld [vmem:[%s1248_s2] sm:$0xff]  ;;  %v1032_v13 = vld [vmem:[%s1250_s4 + $0x18] sm:$0xff]  ;;  %v1073_v21 = vand.u32 127, %v32_v20  ;;  %s951_s2 = smov [#allocation2]   ;;  %s807_s27 = sshll.u32 %s1252_s6, 4  ;;  %s808_s27 = int_to_ptr.hbm [resolvable:$true] %s807_s27 }
   0x8   :  { %858 = vmatpush.msra.mxu2 %v83_v12  ;;  %204 = vmatpush.msra.mxu1 %v83_v12  ;;  %v1037_v14 = vld [vmem:[%s1250_s4 + $0x10] sm:$0xff]  ;;  %v92_v16 = vld [vmem:[%s1247_s1 + $0x38] sm:$0xff]  ;;  %v1054_v17 = vld [vmem:[%s1250_s4 + $0x8] sm:$0xff]  ;;  %s805_s24 = sshll.u32 %s951_s2, 4  ;;  %s806_s24 = int_to_ptr.vmem [resolvable:$true] %s805_s24 }
   0x9   :  { %331 = vmatpush.msrb.mxu3 %v1032_v13  ;;  %v91_v15 = vld [vmem:[%s1247_s1 + $0x30] sm:$0xff]  ;;  %v1059_v18 = vld [vmem:[%s1250_s4] sm:$0xff]  ;;  %s947_s4 = smov 64   ;;  %v25_v58 = vld [vmem:[%s1246_s0 + $0x8] sm:$0xff] }
   0xa   :  { %56 = vperm.xlu0 %865, %v31_v6   ;;  %261 = vmatpush.msrb.mxu2 %v1032_v13  ;;  %v868_v19 = vld [vmem:[%s1251_s5 + $0x1] ss:$0 sm:$0xff]  ;;  %v1104_v37 = vld [vmem:[%s1251_s5] ss:$0 sm:$0xff] }
   0xb   :  { %332 = vmatpush.msrb.mxu3 %v1037_v14  ;;  %290 = vrot.lane.b32.xlu1 %v868_v19, %s947_s4 }
   0xc   :  { %826 = vmatmul.msk.f32.gmra.mxu0 %vm94_vm1, %v86_v7  ;;  %262 = vmatpush.msrb.mxu2 %v1037_v14 }
   0xd   :  { %832 = vmatmul.msk.f32.vlgmr.msra.gmra.mxu3 %vm94_vm1, %v92_v16 }
   0xe   :  { %263 = vmatpush.msrb.mxu2 %v1054_v17  ;;  %333 = vmatpush.msrb.mxu3 %v1054_v17 }
  0x10   :  { %264 = vmatpush.msrb.mxu2 %v1059_v18  ;;  %334 = vmatpush.msrb.mxu3 %v1059_v18 }
  0x12   :  { %463 = vmatpush.msra.mxu3 %v1032_v13 }
  0x14   :  { %827 = vmatmul.msk.f32.gmra.mxu0 %vm94_vm1, %v87_v8  ;;  %464 = vmatpush.msra.mxu3 %v1037_v14 }
  0x16   :  { %465 = vmatpush.msra.mxu3 %v1054_v17 }
  0x18   :  { %466 = vmatpush.msra.mxu3 %v1059_v18 }
  0x1c   :  { %828 = vmatmul.msk.f32.gmra.mxu0 %vm94_vm1, %v88_v9 }
  0x24   :  { %829 = vmatmul.msk.f32.gmra.mxu0 %vm94_vm1, %v89_v10 }
  0x2c   :  { %830 = vmatmul.msk.f32.gmra.mxu0 %vm94_vm1, %v90_v11 }
  0x34   :  { %831 = vmatmul.msk.f32.gmra.mxu0 %vm94_vm1, %v91_v15 }
  0x74   :  { %v54_v22 = vpop.permute.xlu0 %53  ;;  %v36_v23 = vpop.permute.xlu1 %35 }
  0x75   :  { %vm64_vm3 = vcmp.eq.s32.totalorder %v54_v22, %v1073_v21  ;;  %vm58_vm4 = vcmp.eq.s32.totalorder %v36_v23, %v1073_v21 }
  0x76   :  { %v822_v25 = vsel %vm64_vm3, 1.0, %v948_v24  ;;  %v816_v26 = vsel %vm58_vm4, 1.0, %v948_v24 }
  0x77   :  { %839 = vmatmul.msk.f32.vlgmr.msra.gmra.mxu2 %vm164_vm2, %v822_v25  ;;  %833 = vmatmul.msk.f32.vlgmr.msra.gmra.mxu1 %vm164_vm2, %v816_v26 }
  0x78   :  { %397 = vmatpush.msra.mxu2 %v1032_v13 }
  0x7a   :  { %398 = vmatpush.msra.mxu2 %v1037_v14 }
  0x7c   :  { %v57_v27 = vpop.permute.xlu0 %56  ;;  %399 = vmatpush.msra.mxu2 %v1054_v17 }
  0x7d   :  { %vm65_vm5 = vcmp.eq.s32.totalorder %v57_v27, %v1073_v21  ;;  %v1097_v31 = vpop.permute.xlu1 %290 }
  0x7e   :  { %v823_v28 = vsel %vm65_vm5, 1.0, %v948_v24  ;;  %400 = vmatpush.msra.mxu2 %v1059_v18 }
  0x7f   :  { %840 = vmatmul.msk.f32.gmra.mxu2 %vm164_vm2, %v823_v28 }
  0x81   :  { %v140_v35 = vpop.f32.mrf.mxu0 }
  0x87   :  { %265 = vmatmul.f32.vlgmr.msrb.gmra.mxu2 %v948_v24 }
  0x88   :  { %529 = vmatpush.msrb.mxu2 %v1032_v13 }
  0x89   :  { %v143_v7 = vpop.f32.mrf.mxu0 }
  0x8a   :  { %530 = vmatpush.msrb.mxu2 %v1037_v14 }
  0x8c   :  { %531 = vmatpush.msrb.mxu2 %v1054_v17 }
  0x8e   :  { %532 = vmatpush.msrb.mxu2 %v1059_v18 }
  0x90   :  { %v1124_v3 = vpop.f32.mrf.mxu3 }
  0xf4   :  { %v206_v34 = vpop.f32.mrf.mxu1 }
  0xf5   :  { %v207_v36 = vadd.f32 %v206_v34, %v140_v35  ;;  %v26_v35 = vld [vmem:[%s1246_s0 + $0x10] sm:$0xff] }
  0xf7   :  { %v231_v38 = vadd.f32 %v1104_v37, %v207_v36 }
  0xfa   :  { %v1093_v29 = vpop.f32.mrf.mxu2 }
 0x102   :  { %v1095_v30 = vpop.f32.mrf.mxu2 }
 0x10a   :  { %v266_v32 = vpop.f32.mrf.mxu2 }
 0x10b   :  { %v293_v33 = vadd.f32 %v1097_v31, %v266_v32  ;;  %v269_v39 = vadd.f32 %v266_v32, %v231_v38 }
 0x10d   :  { %295 = vrot.lane.b32.xlu2 %v293_v33, %s947_s4  ;;  %v841_v40 = vmul.f32 -1.442695, %v269_v39 }
 0x10f   :  { %872 = vpow2.f32 %v841_v40 }
 0x115   :  { %v873_v41 = vpop.eup %872 }
 0x116   :  { %v273_v42 = vadd.f32 1.0, %v873_v41 }
 0x118   :  { %874 = vrcp.f32 %v273_v42  ;;  %v285_v48 = vand.u32 2147483648, %v273_v42  ;;  %vm279_vm7 = vweird.f32 %v273_v42  ;;  %v283_v49 = vand.u32 2147483647, %v273_v42 }
 0x11a   :  { %v286_v51 = vor.u32 1.1754944e-38, %v285_v48  ;;  %vm284_vm9 = vcmp.eq.f32.partialorder %v283_v49, 8.507059e+37 }
 0x11e   :  { %v875_v43 = vpop.eup %874 }
 0x11f   :  { %v275_v44 = vmul.f32 %v875_v43, %v273_v42  ;;  %vm280_vm6 = vweird.f32 %v875_v43 }
 0x120   :  { %vm281_vm8 = vmor %vm279_vm7, %vm280_vm6 }
 0x121   :  { %v276_v45 = vsub.f32 1.0, %v275_v44 }
 0x123   :  { %v277_v46 = vmul.f32 %v875_v43, %v276_v45 }
 0x125   :  { %v278_v47 = vadd.f32 %v875_v43, %v277_v46 }
 0x127   :  { %v282_v50 = vsel %vm281_vm8, %v875_v43, %v278_v47 }
 0x128   :  { %v287_v52 = vsel %vm284_vm9, %v286_v51, %v282_v50  ;;  %v146_v51 = vpop.f32.mrf.mxu0 }
 0x129   :  { %v305_v59 = vsub.f32 1.0, %v287_v52  ;;  %v311_v61 = vmul.f32 0.0, %v287_v52 }
 0x167   :  { %v296_v53 = vpop.permute.xlu2 %295 }
 0x168   :  { %v298_v54 = vmul.f32 %v296_v53, %v287_v52 }
 0x16a   :  { %300 = vrot.lane.b32.xlu2 %v298_v54, %s947_s4 }
 0x172   :  { %38 = vperm.xlu2 %867, %v25_v58  }
 0x1c4   :  { %v301_v55 = vpop.permute.xlu2 %300 }
 0x1c5   :  { %v303_v56 = vadd.f32 %v301_v55, %v231_v38 }
 0x1c7   :  { %876 = vtanh.f32 %v303_v56 }
 0x1cc   :  { %v39_v0 = vpop.permute.xlu2 %38 }
 0x1cd   :  { %v877_v57 = vpop.eup %876  ;;  %vm59_vm10 = vcmp.eq.s32.totalorder %v39_v0, %v1073_v21 }
 0x1ce   :  { %307 = vrot.lane.b32.xlu0 %v877_v57, %s949_s9  ;;  %v817_v1 = vsel %vm59_vm10, 1.0, %v948_v24 }
 0x1cf   :  { %834 = vmatmul.msk.f32.gmra.mxu1 %vm164_vm2, %v817_v1 }
 0x240   :  { %v308_v60 = vpop.permute.xlu0 %307 }
 0x241   :  { %v310_v62 = vmul.f32 %v308_v60, %v305_v59 }
 0x243   :  { %v1112_v63 = vadd.f32 %v311_v61, %v310_v62 }
 0x245   :  { %315 = vrot.lane.b32.xlu1 %v1112_v63, %s949_s9 }
 0x24c   :  { %v209_v6 = vpop.f32.mrf.mxu1 }
 0x24d   :  { %v210_v8 = vadd.f32 %v209_v6, %v143_v7 }
 0x24f   :  { %v232_v9 = vadd.f32 %v1104_v37, %v210_v8  ;;  %v27_v8 = vld [vmem:[%s1246_s0 + $0x18] sm:$0xff] }
 0x2b7   :  { %v316_v2 = vpop.permute.xlu1 %315 }
 0x2b8   :  { %842 = vmatmul.msk.f32.vlgmr.msrb.gmra.mxu3 %vm245_vm11, %v316_v2 }
 0x2b9   :  { %595 = vmatpush.msrb.mxu3 %v1032_v13 }
 0x2bb   :  { %596 = vmatpush.msrb.mxu3 %v1037_v14 }
 0x2bd   :  { %597 = vmatpush.msrb.mxu3 %v1054_v17 }
 0x2bf   :  { %598 = vmatpush.msrb.mxu3 %v1059_v18 }
 0x33b   :  { %v336_v4 = vpop.f32.mrf.mxu3 }
 0x33c   :  { %v359_v5 = vadd.f32 %v336_v4, %v1097_v31  ;;  %v339_v10 = vadd.f32 %v336_v4, %v232_v9 }
 0x33e   :  { %361 = vrot.lane.b32.xlu0 %v359_v5, %s947_s4  ;;  %v843_v11 = vmul.f32 -1.442695, %v339_v10 }
 0x340   :  { %878 = vpow2.f32 %v843_v11 }
 0x346   :  { %v879_v12 = vpop.eup %878 }
 0x347   :  { %v343_v15 = vadd.f32 1.0, %v879_v12 }
 0x349   :  { %880 = vrcp.f32 %v343_v15  ;;  %v355_v25 = vand.u32 2147483648, %v343_v15  ;;  %vm349_vm13 = vweird.f32 %v343_v15  ;;  %v353_v26 = vand.u32 2147483647, %v343_v15 }
 0x34b   :  { %v356_v28 = vor.u32 1.1754944e-38, %v355_v25  ;;  %vm354_vm15 = vcmp.eq.f32.partialorder %v353_v26, 8.507059e+37 }
 0x34f   :  { %v881_v16 = vpop.eup %880 }
 0x350   :  { %v345_v19 = vmul.f32 %v881_v16, %v343_v15  ;;  %vm350_vm12 = vweird.f32 %v881_v16 }
 0x351   :  { %vm351_vm14 = vmor %vm349_vm13, %vm350_vm12 }
 0x352   :  { %v346_v20 = vsub.f32 1.0, %v345_v19 }
 0x354   :  { %v347_v22 = vmul.f32 %v881_v16, %v346_v20 }
 0x356   :  { %v348_v23 = vadd.f32 %v881_v16, %v347_v22 }
 0x358   :  { %v352_v27 = vsel %vm351_vm14, %v881_v16, %v348_v23 }
 0x359   :  { %v357_v33 = vsel %vm354_vm15, %v356_v28, %v352_v27 }
 0x35a   :  { %v371_v42 = vsub.f32 1.0, %v357_v33  ;;  %v377_v44 = vmul.f32 %v357_v33, %v1112_v63 }
 0x3b0   :  { %v362_v32 = vpop.permute.xlu0 %361 }
 0x3b1   :  { %v364_v34 = vmul.f32 %v362_v32, %v357_v33  ;;  %v149_v32 = vpop.f32.mrf.mxu0 }
 0x3b3   :  { %366 = vrot.lane.b32.xlu1 %v364_v34, %s947_s4 }
 0x3bb   :  { %41 = vperm.xlu1 %866, %v26_v35  }
 0x425   :  { %v367_v36 = vpop.permute.xlu1 %366 }
 0x426   :  { %v369_v38 = vadd.f32 %v367_v36, %v232_v9 }
 0x428   :  { %882 = vtanh.f32 %v369_v38 }
 0x42d   :  { %v42_v39 = vpop.permute.xlu1 %41 }
 0x42e   :  { %v883_v40 = vpop.eup %882  ;;  %vm60_vm0 = vcmp.eq.s32.totalorder %v42_v39, %v1073_v21 }
 0x42f   :  { %v818_v41 = vsel %vm60_vm0, 1.0, %v948_v24  ;;  %373 = vrot.lane.b32.xlu2 %v883_v40, %s949_s9 }
 0x430   :  { %835 = vmatmul.msk.f32.gmra.mxu1 %vm164_vm2, %v818_v41 }
 0x489   :  { %v374_v43 = vpop.permute.xlu2 %373 }
 0x48a   :  { %v376_v45 = vmul.f32 %v374_v43, %v371_v42 }
 0x48c   :  { %v1138_v46 = vadd.f32 %v377_v44, %v376_v45 }
 0x48e   :  { %381 = vrot.lane.b32.xlu0 %v1138_v46, %s949_s9 }
 0x4ad   :  { %v212_v50 = vpop.f32.mrf.mxu1 }
 0x4ae   :  { %v213_v52 = vadd.f32 %v212_v50, %v146_v51 }
 0x4b0   :  { %v233_v53 = vadd.f32 %v1104_v37, %v213_v52 }
 0x500   :  { %v382_v47 = vpop.permute.xlu0 %381 }
 0x501   :  { %844 = vmatmul.msk.f32.vlgmr.msra.gmra.mxu2 %vm245_vm11, %v382_v47 }
 0x502   :  { %661 = vmatpush.msra.mxu2 %v1032_v13 }
 0x504   :  { %662 = vmatpush.msra.mxu2 %v1037_v14 }
 0x506   :  { %663 = vmatpush.msra.mxu2 %v1054_v17 }
 0x508   :  { %664 = vmatpush.msra.mxu2 %v1059_v18 }
 0x584   :  { %v402_v48 = vpop.f32.mrf.mxu2 }
 0x585   :  { %v425_v49 = vadd.f32 %v402_v48, %v1097_v31  ;;  %v405_v54 = vadd.f32 %v402_v48, %v233_v53 }
 0x587   :  { %427 = vrot.lane.b32.xlu2 %v425_v49, %s947_s4  ;;  %v845_v55 = vmul.f32 -1.442695, %v405_v54  ;;  %v28_v49 = vld [vmem:[%s1246_s0 + $0x20] sm:$0xff] }
 0x589   :  { %884 = vpow2.f32 %v845_v55 }
 0x58f   :  { %v885_v56 = vpop.eup %884 }
 0x590   :  { %v409_v57 = vadd.f32 1.0, %v885_v56 }
 0x592   :  { %886 = vrcp.f32 %v409_v57  ;;  %v421_v0 = vand.u32 2147483648, %v409_v57  ;;  %vm415_vm3 = vweird.f32 %v409_v57  ;;  %v419_v1 = vand.u32 2147483647, %v409_v57 }
 0x594   :  { %v422_v4 = vor.u32 1.1754944e-38, %v421_v0  ;;  %vm420_vm5 = vcmp.eq.f32.partialorder %v419_v1, 8.507059e+37  ;;  %v152_v1 = vpop.f32.mrf.mxu0 }
 0x598   :  { %v887_v58 = vpop.eup %886 }
 0x599   :  { %v411_v59 = vmul.f32 %v887_v58, %v409_v57  ;;  %vm416_vm1 = vweird.f32 %v887_v58 }
 0x59a   :  { %vm417_vm4 = vmor %vm415_vm3, %vm416_vm1 }
 0x59b   :  { %v412_v60 = vsub.f32 1.0, %v411_v59 }
 0x59d   :  { %v413_v61 = vmul.f32 %v887_v58, %v412_v60 }
 0x59f   :  { %v414_v62 = vadd.f32 %v887_v58, %v413_v61 }
 0x5a1   :  { %v418_v2 = vsel %vm417_vm4, %v887_v58, %v414_v62 }
 0x5a2   :  { %v423_v6 = vsel %vm420_vm5, %v422_v4, %v418_v2 }
 0x5a3   :  { %v437_v16 = vsub.f32 1.0, %v423_v6  ;;  %v443_v20 = vmul.f32 %v423_v6, %v1138_v46 }
 0x5e1   :  { %v428_v5 = vpop.permute.xlu2 %427 }
 0x5e2   :  { %v430_v7 = vmul.f32 %v428_v5, %v423_v6 }
 0x5e4   :  { %432 = vrot.lane.b32.xlu0 %v430_v7, %s947_s4 }
 0x5ec   :  { %44 = vperm.xlu0 %865, %v27_v8  }
 0x656   :  { %v433_v9 = vpop.permute.xlu0 %432 }
 0x657   :  { %v435_v10 = vadd.f32 %v433_v9, %v233_v53 }
 0x659   :  { %888 = vtanh.f32 %v435_v10 }
 0x65e   :  { %v45_v11 = vpop.permute.xlu0 %44 }
 0x65f   :  { %v889_v12 = vpop.eup %888  ;;  %vm61_vm6 = vcmp.eq.s32.totalorder %v45_v11, %v1073_v21 }
 0x660   :  { %v819_v15 = vsel %vm61_vm6, 1.0, %v948_v24  ;;  %439 = vrot.lane.b32.xlu1 %v889_v12, %s949_s9 }
 0x661   :  { %836 = vmatmul.msk.f32.gmra.mxu1 %vm164_vm2, %v819_v15 }
 0x6d2   :  { %v440_v19 = vpop.permute.xlu1 %439 }
 0x6d3   :  { %v442_v22 = vmul.f32 %v440_v19, %v437_v16 }
 0x6d5   :  { %v1159_v23 = vadd.f32 %v443_v20, %v442_v22 }
 0x6d7   :  { %447 = vrot.lane.b32.xlu2 %v1159_v23, %s949_s9 }
 0x6de   :  { %v215_v28 = vpop.f32.mrf.mxu1 }
 0x6df   :  { %v216_v33 = vadd.f32 %v215_v28, %v149_v32  ;;  %v29_v28 = vld [vmem:[%s1246_s0 + $0x28] sm:$0xff] }
 0x6e1   :  { %v234_v34 = vadd.f32 %v1104_v37, %v216_v33 }
 0x731   :  { %v448_v25 = vpop.permute.xlu2 %447 }
 0x732   :  { %846 = vmatmul.msk.f32.vlgmr.msra.gmra.mxu3 %vm245_vm11, %v448_v25 }
 0x733   :  { %727 = vmatpush.msra.mxu3 %v1032_v13 }
 0x735   :  { %728 = vmatpush.msra.mxu3 %v1037_v14 }
 0x737   :  { %729 = vmatpush.msra.mxu3 %v1054_v17 }
 0x739   :  { %730 = vmatpush.msra.mxu3 %v1059_v18 }
 0x7b5   :  { %v468_v26 = vpop.f32.mrf.mxu3 }
 0x7b6   :  { %v491_v27 = vadd.f32 %v468_v26, %v1097_v31  ;;  %v471_v35 = vadd.f32 %v468_v26, %v234_v34 }
 0x7b8   :  { %493 = vrot.lane.b32.xlu1 %v491_v27, %s947_s4  ;;  %v847_v36 = vmul.f32 -1.442695, %v471_v35 }
 0x7ba   :  { %890 = vpow2.f32 %v847_v36 }
 0x7c0   :  { %v891_v13 = vpop.eup %890 }
 0x7c1   :  { %v475_v38 = vadd.f32 1.0, %v891_v13 }
 0x7c3   :  { %892 = vrcp.f32 %v475_v38  ;;  %v487_v41 = vand.u32 2147483648, %v475_v38  ;;  %vm481_vm8 = vweird.f32 %v475_v38  ;;  %v485_v42 = vand.u32 2147483647, %v475_v38 }
 0x7c5   :  { %v488_v44 = vor.u32 1.1754944e-38, %v487_v41  ;;  %vm486_vm10 = vcmp.eq.f32.partialorder %v485_v42, 8.507059e+37  ;;  %v155_v41 = vpop.f32.mrf.mxu0 }
 0x7c9   :  { %v893_v14 = vpop.eup %892 }
 0x7ca   :  { %v477_v17 = vmul.f32 %v893_v14, %v475_v38  ;;  %vm482_vm7 = vweird.f32 %v893_v14 }
 0x7cb   :  { %vm483_vm9 = vmor %vm481_vm8, %vm482_vm7 }
 0x7cc   :  { %v478_v39 = vsub.f32 1.0, %v477_v17 }
 0x7ce   :  { %v479_v18 = vmul.f32 %v893_v14, %v478_v39 }
 0x7d0   :  { %v480_v40 = vadd.f32 %v893_v14, %v479_v18 }
 0x7d2   :  { %v484_v43 = vsel %vm483_vm9, %v893_v14, %v480_v40 }
 0x7d3   :  { %v489_v47 = vsel %vm486_vm10, %v488_v44, %v484_v43 }
 0x7d4   :  { %v503_v55 = vsub.f32 1.0, %v489_v47  ;;  %v509_v57 = vmul.f32 %v489_v47, %v1159_v23 }
 0x82a   :  { %v494_v45 = vpop.permute.xlu1 %493 }
 0x82b   :  { %v496_v48 = vmul.f32 %v494_v45, %v489_v47 }
 0x82d   :  { %498 = vrot.lane.b32.xlu2 %v496_v48, %s947_s4 }
 0x835   :  { %47 = vperm.xlu2 %867, %v28_v49  }
 0x887   :  { %v499_v50 = vpop.permute.xlu2 %498 }
 0x888   :  { %v501_v51 = vadd.f32 %v499_v50, %v234_v34 }
 0x88a   :  { %894 = vtanh.f32 %v501_v51 }
 0x88f   :  { %v48_v52 = vpop.permute.xlu2 %47 }
 0x890   :  { %v895_v53 = vpop.eup %894  ;;  %vm62_vm12 = vcmp.eq.s32.totalorder %v48_v52, %v1073_v21 }
 0x891   :  { %v820_v54 = vsel %vm62_vm12, 1.0, %v948_v24  ;;  %505 = vrot.lane.b32.xlu0 %v895_v53, %s949_s9 }
 0x892   :  { %837 = vmatmul.msk.f32.gmra.mxu1 %vm164_vm2, %v820_v54 }
 0x903   :  { %v506_v56 = vpop.permute.xlu0 %505 }
 0x904   :  { %v508_v58 = vmul.f32 %v506_v56, %v503_v55 }
 0x906   :  { %v1180_v59 = vadd.f32 %v509_v57, %v508_v58 }
 0x908   :  { %513 = vrot.lane.b32.xlu1 %v1180_v59, %s949_s9 }
 0x90f   :  { %v218_v0 = vpop.f32.mrf.mxu1 }
 0x910   :  { %v219_v2 = vadd.f32 %v218_v0, %v152_v1 }
 0x912   :  { %v235_v4 = vadd.f32 %v1104_v37, %v219_v2 }
 0x97a   :  { %v514_v60 = vpop.permute.xlu1 %513 }
 0x97b   :  { %848 = vmatmul.msk.f32.vlgmr.msrb.gmra.mxu2 %vm245_vm11, %v514_v60 }
 0x9fe   :  { %v534_v61 = vpop.f32.mrf.mxu2 }
 0x9ff   :  { %v557_v62 = vadd.f32 %v534_v61, %v1097_v31  ;;  %v537_v5 = vadd.f32 %v534_v61, %v235_v4 }
 0xa01   :  { %559 = vrot.lane.b32.xlu0 %v557_v62, %s947_s4  ;;  %v849_v6 = vmul.f32 -1.442695, %v537_v5 }
 0xa03   :  { %896 = vpow2.f32 %v849_v6 }
 0xa09   :  { %v897_v7 = vpop.eup %896 }
 0xa0a   :  { %v541_v8 = vadd.f32 1.0, %v897_v7 }
 0xa0c   :  { %898 = vrcp.f32 %v541_v8  ;;  %v553_v16 = vand.u32 2147483648, %v541_v8  ;;  %vm547_vm14 = vweird.f32 %v541_v8  ;;  %v551_v19 = vand.u32 2147483647, %v541_v8 }
 0xa0e   :  { %v554_v22 = vor.u32 1.1754944e-38, %v553_v16  ;;  %vm552_vm0 = vcmp.eq.f32.partialorder %v551_v19, 8.507059e+37 }
 0xa12   :  { %v899_v9 = vpop.eup %898 }
 0xa13   :  { %v543_v10 = vmul.f32 %v899_v9, %v541_v8  ;;  %vm548_vm13 = vweird.f32 %v899_v9 }
 0xa14   :  { %vm549_vm15 = vmor %vm547_vm14, %vm548_vm13 }
 0xa15   :  { %v544_v11 = vsub.f32 1.0, %v543_v10 }
 0xa17   :  { %v545_v12 = vmul.f32 %v899_v9, %v544_v11  ;;  %v158_v11 = vpop.f32.mrf.mxu0 }
 0xa19   :  { %v546_v15 = vadd.f32 %v899_v9, %v545_v12  ;;  %v225_v12 = vadd.f32 %v1093_v29, %v158_v11 }
 0xa1b   :  { %v550_v20 = vsel %vm549_vm15, %v899_v9, %v546_v15  ;;  %v237_v15 = vadd.f32 %v1104_v37, %v225_v12 }
 0xa1c   :  { %v555_v26 = vsel %vm552_vm0, %v554_v22, %v550_v20 }
 0xa1d   :  { %v569_v13 = vsub.f32 1.0, %v555_v26  ;;  %v575_v14 = vmul.f32 %v555_v26, %v1180_v59 }
 0xa73   :  { %v560_v25 = vpop.permute.xlu0 %559 }
 0xa74   :  { %v562_v27 = vmul.f32 %v560_v25, %v555_v26 }
 0xa76   :  { %564 = vrot.lane.b32.xlu1 %v562_v27, %s947_s4 }
 0xa7e   :  { %50 = vperm.xlu1 %866, %v29_v28  }
 0xae8   :  { %v565_v32 = vpop.permute.xlu1 %564 }
 0xae9   :  { %v567_v33 = vadd.f32 %v565_v32, %v235_v4 }
 0xaeb   :  { %900 = vtanh.f32 %v567_v33 }
 0xaf0   :  { %v51_v34 = vpop.permute.xlu1 %50 }
 0xaf1   :  { %v901_v35 = vpop.eup %900  ;;  %vm63_vm1 = vcmp.eq.s32.totalorder %v51_v34, %v1073_v21 }
 0xaf2   :  { %v821_v36 = vsel %vm63_vm1, 1.0, %v948_v24  ;;  %571 = vrot.lane.b32.xlu2 %v901_v35, %s949_s9 }
 0xaf3   :  { %838 = vmatmul.msk.f32.gmra.mxu1 %vm164_vm2, %v821_v36 }
 0xb4c   :  { %v572_v38 = vpop.permute.xlu2 %571 }
 0xb4d   :  { %v574_v17 = vmul.f32 %v572_v38, %v569_v13 }
 0xb4f   :  { %v1197_v39 = vadd.f32 %v575_v14, %v574_v17 }
 0xb51   :  { %579 = vrot.lane.b32.xlu0 %v1197_v39, %s949_s9 }
 0xb70   :  { %v221_v40 = vpop.f32.mrf.mxu1 }
 0xb71   :  { %v222_v42 = vadd.f32 %v221_v40, %v155_v41 }
 0xb73   :  { %v236_v43 = vadd.f32 %v1104_v37, %v222_v42 }
 0xbc3   :  { %v580_v18 = vpop.permute.xlu0 %579 }
 0xbc4   :  { %850 = vmatmul.msk.f32.vlgmr.msrb.gmra.mxu3 %vm245_vm11, %v580_v18 }
 0xc47   :  { %v600_v21 = vpop.f32.mrf.mxu3 }
 0xc48   :  { %v623_v24 = vadd.f32 %v600_v21, %v1097_v31  ;;  %v603_v44 = vadd.f32 %v600_v21, %v236_v43 }
 0xc4a   :  { %625 = vrot.lane.b32.xlu2 %v623_v24, %s947_s4  ;;  %v851_v45 = vmul.f32 -1.442695, %v603_v44 }
 0xc4c   :  { %902 = vpow2.f32 %v851_v45 }
 0xc52   :  { %v903_v47 = vpop.eup %902 }
 0xc53   :  { %v607_v48 = vadd.f32 1.0, %v903_v47  ;;  %v228_v47 = vadd.f32 %v1095_v30, %v1124_v3 }
 0xc55   :  { %904 = vrcp.f32 %v607_v48  ;;  %v619_v54 = vand.u32 2147483648, %v607_v48  ;;  %vm613_vm3 = vweird.f32 %v607_v48  ;;  %v617_v55 = vand.u32 2147483647, %v607_v48 }
 0xc57   :  { %v620_v57 = vor.u32 1.1754944e-38, %v619_v54  ;;  %vm618_vm5 = vcmp.eq.f32.partialorder %v617_v55, 8.507059e+37 }
 0xc5b   :  { %v905_v49 = vpop.eup %904 }
 0xc5c   :  { %v609_v50 = vmul.f32 %v905_v49, %v607_v48  ;;  %vm614_vm2 = vweird.f32 %v905_v49  ;;  %v238_v48 = vadd.f32 %v1104_v37, %v228_v47 }
 0xc5d   :  { %vm615_vm4 = vmor %vm613_vm3, %vm614_vm2 }
 0xc5e   :  { %v610_v51 = vsub.f32 1.0, %v609_v50 }
 0xc60   :  { %v611_v52 = vmul.f32 %v905_v49, %v610_v51 }
 0xc62   :  { %v612_v53 = vadd.f32 %v905_v49, %v611_v52 }
 0xc64   :  { %v616_v56 = vsel %vm615_vm4, %v905_v49, %v612_v53 }
 0xc65   :  { %v621_v60 = vsel %vm618_vm5, %v620_v57, %v616_v56 }
 0xc66   :  { %v635_v2 = vsub.f32 1.0, %v621_v60  ;;  %v641_v5 = vmul.f32 %v621_v60, %v1197_v39 }
 0xca4   :  { %v626_v58 = vpop.permute.xlu2 %625 }
 0xca5   :  { %v628_v61 = vmul.f32 %v626_v58, %v621_v60 }
 0xca7   :  { %630 = vrot.lane.b32.xlu0 %v628_v61, %s947_s4 }
 0xd19   :  { %v631_v62 = vpop.permute.xlu0 %630 }
 0xd1a   :  { %v633_v0 = vadd.f32 %v631_v62, %v236_v43  ;;  %v870_v62 = vld [vmem:[%s1251_s5 + $0x2] ss:$0 sm:$0xff] }
 0xd1c   :  { %906 = vtanh.f32 %v633_v0 }
 0xd22   :  { %v907_v1 = vpop.eup %906 }
 0xd23   :  { %637 = vrot.lane.b32.xlu1 %v907_v1, %s949_s9 }
 0xd95   :  { %v638_v4 = vpop.permute.xlu1 %637 }
 0xd96   :  { %v640_v6 = vmul.f32 %v638_v4, %v635_v2  ;;  %v379_v4 = vadd.f32 %v1138_v46, %v1112_v63 }
 0xd98   :  { %v1208_v7 = vadd.f32 %v641_v5, %v640_v6  ;;  %v445_v5 = vadd.f32 %v1159_v23, %v379_v4  ;;  %v871_v23 = vld [vmem:[%s1251_s5 + $0x3] ss:$0 sm:$0xff] }
 0xd9a   :  { %645 = vrot.lane.b32.xlu2 %v1208_v7, %s949_s9  ;;  %v511_v6 = vadd.f32 %v1180_v59, %v445_v5 }
 0xdf4   :  { %v646_v8 = vpop.permute.xlu2 %645 }
 0xdf5   :  { %852 = vmatmul.msk.f32.vlgmr.msra.gmra.mxu2 %vm245_vm11, %v646_v8  ;;  %v577_v8 = vadd.f32 %v1197_v39, %v511_v6 }
 0xe78   :  { %v666_v9 = vpop.f32.mrf.mxu2 }
 0xe79   :  { %v689_v10 = vadd.f32 %v666_v9, %v1097_v31  ;;  %v669_v16 = vadd.f32 %v666_v9, %v237_v15 }
 0xe7b   :  { %691 = vrot.lane.b32.xlu0 %v689_v10, %s947_s4  ;;  %v853_v19 = vmul.f32 -1.442695, %v669_v16 }
 0xe7d   :  { %908 = vpow2.f32 %v853_v19 }
 0xe83   :  { %v909_v20 = vpop.eup %908 }
 0xe84   :  { %v673_v22 = vadd.f32 1.0, %v909_v20 }
 0xe86   :  { %910 = vrcp.f32 %v673_v22  ;;  %v685_v33 = vand.u32 2147483648, %v673_v22  ;;  %vm679_vm7 = vweird.f32 %v673_v22  ;;  %v683_v34 = vand.u32 2147483647, %v673_v22 }
 0xe88   :  { %v686_v29 = vor.u32 1.1754944e-38, %v685_v33  ;;  %vm684_vm9 = vcmp.eq.f32.partialorder %v683_v34, 8.507059e+37 }
 0xe8c   :  { %v911_v25 = vpop.eup %910 }
 0xe8d   :  { %v675_v26 = vmul.f32 %v911_v25, %v673_v22  ;;  %vm680_vm6 = vweird.f32 %v911_v25 }
 0xe8e   :  { %vm681_vm8 = vmor %vm679_vm7, %vm680_vm6 }
 0xe8f   :  { %v676_v27 = vsub.f32 1.0, %v675_v26 }
 0xe91   :  { %v677_v28 = vmul.f32 %v911_v25, %v676_v27 }
 0xe93   :  { %v678_v32 = vadd.f32 %v911_v25, %v677_v28 }
 0xe95   :  { %v682_v35 = vsel %vm681_vm8, %v911_v25, %v678_v32 }
 0xe96   :  { %v687_v13 = vsel %vm684_vm9, %v686_v29, %v682_v35 }
 0xe97   :  { %v701_v21 = vsub.f32 1.0, %v687_v13  ;;  %v707_v40 = vmul.f32 %v687_v13, %v1208_v7 }
 0xeed   :  { %v692_v36 = vpop.permute.xlu0 %691 }
 0xeee   :  { %v694_v38 = vmul.f32 %v692_v36, %v687_v13 }
 0xef0   :  { %696 = vrot.lane.b32.xlu1 %v694_v38, %s947_s4 }
 0xf62   :  { %v697_v14 = vpop.permute.xlu1 %696 }
 0xf63   :  { %v699_v17 = vadd.f32 %v697_v14, %v237_v15  ;;  %v643_v15 = vadd.f32 %v1208_v7, %v577_v8 }
 0xf65   :  { %912 = vtanh.f32 %v699_v17 }
 0xf6b   :  { %v913_v18 = vpop.eup %912 }
 0xf6c   :  { %703 = vrot.lane.b32.xlu2 %v913_v18, %s949_s9 }
 0xfc6   :  { %v704_v24 = vpop.permute.xlu2 %703 }
 0xfc7   :  { %v706_v41 = vmul.f32 %v704_v24, %v701_v21 }
 0xfc9   :  { %v708_v42 = vadd.f32 %v707_v40, %v706_v41 }
 0xfcb   :  { %711 = vrot.lane.b32.xlu0 %v708_v42, %s949_s9  ;;  %v709_v19 = vadd.f32 %v708_v42, %v643_v15 }
0x103d   :  { %v712_v43 = vpop.permute.xlu0 %711 }
0x103e   :  { %854 = vmatmul.msk.f32.vlgmr.msra.gmra.mxu3 %vm245_vm11, %v712_v43 }
0x10c1   :  { %v732_v44 = vpop.f32.mrf.mxu3 }
0x10c2   :  { %v755_v45 = vadd.f32 %v732_v44, %v1097_v31  ;;  %v735_v49 = vadd.f32 %v732_v44, %v238_v48 }
0x10c4   :  { %757 = vrot.lane.b32.xlu1 %v755_v45, %s947_s4  ;;  %v855_v50 = vmul.f32 -1.442695, %v735_v49 }
0x10c6   :  { %914 = vpow2.f32 %v855_v50 }
0x10cc   :  { %v915_v51 = vpop.eup %914  ;;  %781 = vrot.lane.b32.xlu1 %v870_v62, %s950_s21 }
0x10cd   :  { %v739_v52 = vadd.f32 1.0, %v915_v51 }
0x10cf   :  { %916 = vrcp.f32 %v739_v52  ;;  %v751_v31 = vand.u32 2147483648, %v739_v52  ;;  %vm745_vm12 = vweird.f32 %v739_v52  ;;  %v749_v58 = vand.u32 2147483647, %v739_v52 }
0x10d1   :  { %v752_v30 = vor.u32 1.1754944e-38, %v751_v31  ;;  %vm750_vm14 = vcmp.eq.f32.partialorder %v749_v58, 8.507059e+37 }
0x10d5   :  { %v917_v53 = vpop.eup %916 }
0x10d6   :  { %v741_v54 = vmul.f32 %v917_v53, %v739_v52  ;;  %vm746_vm10 = vweird.f32 %v917_v53 }
0x10d7   :  { %vm747_vm13 = vmor %vm745_vm12, %vm746_vm10 }
0x10d8   :  { %v742_v55 = vsub.f32 1.0, %v741_v54 }
0x10da   :  { %v743_v56 = vmul.f32 %v917_v53, %v742_v55 }
0x10dc   :  { %v744_v57 = vadd.f32 %v917_v53, %v743_v56 }
0x10de   :  { %v748_v60 = vsel %vm747_vm13, %v917_v53, %v744_v57 }
0x10df   :  { %v753_v3 = vsel %vm750_vm14, %v752_v30, %v748_v60 }
0x10e0   :  { %v767_v9 = vsub.f32 1.0, %v753_v3  ;;  %v773_v11 = vmul.f32 %v753_v3, %v708_v42 }
0x1136   :  { %v758_v37 = vpop.permute.xlu1 %757 }
0x1137   :  { %v760_v61 = vmul.f32 %v758_v37, %v753_v3 }
0x1139   :  { %762 = vrot.lane.b32.xlu2 %v760_v61, %s947_s4 }
0x113e   :  { %v782_v22 = vpop.permute.xlu1 %781 }
0x1193   :  { %v763_v0 = vpop.permute.xlu2 %762 }
0x1194   :  { %v765_v1 = vadd.f32 %v763_v0, %v238_v48 }
0x1196   :  { %918 = vtanh.f32 %v765_v1 }
0x119c   :  { %v919_v2 = vpop.eup %918 }
0x119d   :  { %769 = vrot.lane.b32.xlu0 %v919_v2, %s949_s9 }
0x120f   :  { %v770_v10 = vpop.permute.xlu0 %769 }
0x1210   :  { %v772_v12 = vmul.f32 %v770_v10, %v767_v9 }
0x1212   :  { %v774_v16 = vadd.f32 %v773_v11, %v772_v12 }
0x1214   :  { %v775_v20 = vadd.f32 %v774_v16, %v709_v19 }
0x1216   :  { %v776_v25 = vmul.f32 0.125, %v775_v20 }
0x1218   :  { %v784_v26 = vmul.f32 %v782_v22, %v776_v25 }
0x121a   :  { %786 = vrot.lane.b32.xlu2 %v784_v26, %s949_s9 }
0x1274   :  { %v787_v63 = vpop.permute.xlu2 %786 }
0x1275   :  { %v789_v46 = vsel %vm245_vm11, %v787_v63, 0.0 }
0x1276   :  { %790 = vadd.xlane.f32.xlu0 %v789_v46 }
0x12e9   :  { %v791_v59 = vpop.xlane.xlu0 %790 }
0x12ea   :  { %v793_v39 = vadd.f32 %v871_v23, %v791_v59 }
0x12ec   :  { %796 = vperm.xlu1 %866, %v793_v39  }
0x135e   :  { %v797_v7 = vpop.permute.xlu1 %796 }
0x135f   :  { %799 = vst [vmem:[#allocation2] sm:$0xff] %v797_v7 }
0x1360   :  { %810 = dma.vmem_to_hbm [thread:$0]  %s806_s24, 128, %s808_s27, [#allocation3]  }
0x1361   :  { %944 = dma.done.wait [#allocation3], 128  }
0x1362   :  { %945 = vsyncadd [#allocation3], 4294967168 }
0x1363   :  { %815 = vsyncpa [#allocation3], 1 }

</bundles_post_ra>
